<compile_context>
chip_gen: v5e
topology: v5e:2x2
jax: 0.10.0
libtpu: 0.0.40
codegen_flags: <defaults>
</compile_context>

<pallas_src>
import math
import jax
import jax.numpy as jnp
from jax.experimental import pallas as pl
from jax.experimental.pallas import tpu as pltpu

BN_EPS = 1e-5


def dnn_kernel(d1f1_ref, d1f2_ref, d2f1_ref, d2f2_ref, cell_ref,
               w1_ref, b1_ref, w2_ref, b2_ref, w3_ref, b3_ref,
               out_ref):
    # ---- Linear 1 with the concat fused away: five partial matmuls against
    #      statically-sliced row-bands of W1, accumulated into one f32 tile. ----
    h = None
    off = 0
    for blk_ref in (d1f1_ref, d1f2_ref, d2f1_ref, d2f2_ref, cell_ref):
        xb = blk_ref[...].astype(jnp.float32)
        blk = xb.shape[1]                                   # static block width
        part = jnp.dot(xb, w1_ref[pl.ds(off, blk), :],
                       preferred_element_type=jnp.float32)
        h = part if h is None else h + part
        off += blk
    h = jnp.maximum(h + b1_ref[...], 0.0)

    # ---- BatchNorm1d #1 (training-mode batch stats; affine folded into W2/b2) ----
    mu = jnp.mean(h, axis=0, keepdims=True)
    c = h - mu
    var = jnp.mean(c * c, axis=0, keepdims=True)
    h = c * jax.lax.rsqrt(var + BN_EPS)                     # rsqrt -> EUP slot

    # ---- Linear 2 (BN1 affine pre-folded into w2/b2) + ReLU ----
    h = jnp.maximum(
        jnp.dot(h, w2_ref[...], preferred_element_type=jnp.float32) + b2_ref[...],
        0.0)

    # ---- BatchNorm1d #2 (affine folded into W3/b3) ----
    mu = jnp.mean(h, axis=0, keepdims=True)
    c = h - mu
    var = jnp.mean(c * c, axis=0, keepdims=True)
    h = c * jax.lax.rsqrt(var + BN_EPS)

    # ---- Width-1 head off the MXU: VPU multiply against the broadcast weight
    #      row, lane reduce, written straight to the (B, 1) output. ----
    head = jnp.sum(h * w3_ref[...], axis=1, keepdims=True) + b3_ref[...]
    out_ref[...] = head.astype(out_ref.dtype)


def dnn_orig_forward(d1f1, d1f2, d2f1, d2f2, cell, params):
    B = d1f1.shape[0]

    # Trace-time folding of BN affine params into the next Linear (no runtime cost):
    #   (norm*g1 + be1) @ W2 + b2 == norm @ (g1.T * W2) + (be1 @ W2 + b2)
    #   (norm*g2 + be2) @ W3 + b3 == norm @ (g2   * W3.T).row + (be2 @ W3 + b3)
    w2f = params["w2"] * params["g1"].T                     # (H, H//2), row-scaled
    b2f = params["be1"] @ params["w2"] + params["b2"]       # (1, H//2)
    w3f = params["g2"] * params["w3"].T                     # (1, H//2) weight row for VPU head
    b3f = params["be2"] @ params["w3"] + params["b3"]       # (1, 1)

    vmem = pl.BlockSpec(memory_space=pltpu.MemorySpace.VMEM)
    args = (d1f1, d1f2, d2f1, d2f2, cell,
            params["w1"], params["b1"], w2f, b2f, w3f, b3f)

    out = pl.pallas_call(
        dnn_kernel,
        out_shape=jax.ShapeDtypeStruct((B, 1), jnp.float32),
        in_specs=[vmem] * len(args),
        out_specs=vmem,
    )(*args)
    return out                                              # (B, 1) like the module


def _linear_init(key, fan_in, fan_out):
    # PyTorch-style init: U(-1/sqrt(fan_in), 1/sqrt(fan_in)); weight stored (in, out).
    kw, kb = jax.random.split(key)
    bound = 1.0 / math.sqrt(fan_in)
    w = jax.random.uniform(kw, (fan_in, fan_out), jnp.float32, -bound, bound)
    b = jax.random.uniform(kb, (1, fan_out), jnp.float32, -bound, bound)
    return w, b


def make_params(key, input_size, hidden_size):
    h2 = hidden_size // 2
    k1, k2, k3, kg1, kb1, kg2, kb2 = jax.random.split(key, 7)
    w1, b1 = _linear_init(k1, input_size, hidden_size)
    w2, b2 = _linear_init(k2, hidden_size, h2)
    w3, b3 = _linear_init(k3, h2, 1)
    # BatchNorm affine params (independent keys so they are uncorrelated).
    g1 = 1.0 + 0.1 * jax.random.normal(kg1, (1, hidden_size), jnp.float32)
    be1 = 0.1 * jax.random.normal(kb1, (1, hidden_size), jnp.float32)
    g2 = 1.0 + 0.1 * jax.random.normal(kg2, (1, h2), jnp.float32)
    be2 = 0.1 * jax.random.normal(kb2, (1, h2), jnp.float32)
    return dict(w1=w1, b1=b1, g1=g1, be1=be1,
                w2=w2, b2=b2, g2=g2, be2=be2,
                w3=w3, b3=b3)


def reference_forward(d1f1, d1f2, d2f1, d2f2, cell, p):
    # Faithful (unfolded) reference matching the PyTorch module in training mode.
    feat = jnp.concatenate([d1f1, d1f2, d2f1, d2f2, cell], axis=1)
    h = jnp.maximum(feat @ p["w1"] + p["b1"], 0.0)
    mu = h.mean(0, keepdims=True)
    var = ((h - mu) ** 2).mean(0, keepdims=True)
    h = (h - mu) / jnp.sqrt(var + BN_EPS) * p["g1"] + p["be1"]
    h = jnp.maximum(h @ p["w2"] + p["b2"], 0.0)
    mu = h.mean(0, keepdims=True)
    var = ((h - mu) ** 2).mean(0, keepdims=True)
    h = (h - mu) / jnp.sqrt(var + BN_EPS) * p["g2"] + p["be2"]
    return h @ p["w3"] + p["b3"]


if __name__ == "__main__":
    key = jax.random.PRNGKey(0)
    kp, k1, k2, k3, k4, k5 = jax.random.split(key, 6)

    batch = 8
    drug_dim = 8      # per drug-feature block
    cell_dim = 16
    input_size = 4 * drug_dim + cell_dim   # 48
    hidden_size = 32

    d1f1 = jax.random.normal(k1, (batch, drug_dim), jnp.float32)
    d1f2 = jax.random.normal(k2, (batch, drug_dim), jnp.float32)
    d2f1 = jax.random.normal(k3, (batch, drug_dim), jnp.float32)
    d2f2 = jax.random.normal(k4, (batch, drug_dim), jnp.float32)
    cell = jax.random.normal(k5, (batch, cell_dim), jnp.float32)

    params = make_params(kp, input_size, hidden_size)

    out = dnn_orig_forward(d1f1, d1f2, d2f1, d2f2, cell, params)
    out = jax.block_until_ready(out)

    ref = reference_forward(d1f1, d1f2, d2f1, d2f2, cell, params)
    assert out.shape == (batch, 1)
    # BN-affine folding + the split Linear-1 accumulation change f32 rounding, and
    # training-mode BN (eps=1e-5) can amplify ulp-level differences when a column's
    # batch variance is ~0, so compare with a slightly relaxed tolerance.
    max_diff = float(jnp.max(jnp.abs(out - ref)))
    assert jnp.allclose(out, ref, atol=1e-3, rtol=1e-3), f"max |diff| = {max_diff}"

    print("KERNEL_OK")
</pallas_src>

<mosaic_0001>
module attributes {stable_mosaic.version = 11 : i64} {
  func.func @dnn_kernel(%arg0: memref<8x8xf32, #tpu.memory_space<vmem>>, %arg1: memref<8x8xf32, #tpu.memory_space<vmem>>, %arg2: memref<8x8xf32, #tpu.memory_space<vmem>>, %arg3: memref<8x8xf32, #tpu.memory_space<vmem>>, %arg4: memref<8x16xf32, #tpu.memory_space<vmem>>, %arg5: memref<48x32xf32, #tpu.memory_space<vmem>>, %arg6: memref<1x32xf32, #tpu.memory_space<vmem>>, %arg7: memref<32x16xf32, #tpu.memory_space<vmem>>, %arg8: memref<1x16xf32, #tpu.memory_space<vmem>>, %arg9: memref<1x16xf32, #tpu.memory_space<vmem>>, %arg10: memref<1x1xf32, #tpu.memory_space<vmem>>, %arg11: memref<8x1xf32, #tpu.memory_space<vmem>>) attributes {dimension_semantics = [], scalar_prefetch = 0 : i64, scratch_operands = 0 : i64, tpu.core_type = #tpu.core_type<tc>} {
    %c0 = arith.constant 0 : index
    %c0_0 = arith.constant 0 : index
    %0 = vector.load %arg0[%c0, %c0_0] : memref<8x8xf32, #tpu.memory_space<vmem>>, vector<8x8xf32>
    %c0_1 = arith.constant 0 : index
    %c0_2 = arith.constant 0 : index
    %1 = vector.load %arg5[%c0_1, %c0_2] : memref<48x32xf32, #tpu.memory_space<vmem>>, vector<8x32xf32>
    %cst = arith.constant dense<0.000000e+00> : vector<8x32xf32>
    %2 = tpu.matmul %0, %1, %cst {dimension_numbers = #tpu.dot_dimension_numbers<[1], [0], [0], [1], [0, 0, 1, 1], [], []>} : vector<8x8xf32>, vector<8x32xf32>, vector<8x32xf32> -> vector<8x32xf32>
    %c0_3 = arith.constant 0 : index
    %c0_4 = arith.constant 0 : index
    %3 = vector.load %arg1[%c0_3, %c0_4] : memref<8x8xf32, #tpu.memory_space<vmem>>, vector<8x8xf32>
    %c8 = arith.constant 8 : index
    %c0_5 = arith.constant 0 : index
    %4 = vector.load %arg5[%c8, %c0_5] : memref<48x32xf32, #tpu.memory_space<vmem>>, vector<8x32xf32>
    %cst_6 = arith.constant dense<0.000000e+00> : vector<8x32xf32>
    %5 = tpu.matmul %3, %4, %cst_6 {dimension_numbers = #tpu.dot_dimension_numbers<[1], [0], [0], [1], [0, 0, 1, 1], [], []>} : vector<8x8xf32>, vector<8x32xf32>, vector<8x32xf32> -> vector<8x32xf32>
    %6 = arith.addf %2, %5 : vector<8x32xf32>
    %c0_7 = arith.constant 0 : index
    %c0_8 = arith.constant 0 : index
    %7 = vector.load %arg2[%c0_7, %c0_8] : memref<8x8xf32, #tpu.memory_space<vmem>>, vector<8x8xf32>
    %c16 = arith.constant 16 : index
    %c0_9 = arith.constant 0 : index
    %8 = vector.load %arg5[%c16, %c0_9] : memref<48x32xf32, #tpu.memory_space<vmem>>, vector<8x32xf32>
    %cst_10 = arith.constant dense<0.000000e+00> : vector<8x32xf32>
    %9 = tpu.matmul %7, %8, %cst_10 {dimension_numbers = #tpu.dot_dimension_numbers<[1], [0], [0], [1], [0, 0, 1, 1], [], []>} : vector<8x8xf32>, vector<8x32xf32>, vector<8x32xf32> -> vector<8x32xf32>
    %10 = arith.addf %6, %9 : vector<8x32xf32>
    %c0_11 = arith.constant 0 : index
    %c0_12 = arith.constant 0 : index
    %11 = vector.load %arg3[%c0_11, %c0_12] : memref<8x8xf32, #tpu.memory_space<vmem>>, vector<8x8xf32>
    %c24 = arith.constant 24 : index
    %c0_13 = arith.constant 0 : index
    %12 = vector.load %arg5[%c24, %c0_13] : memref<48x32xf32, #tpu.memory_space<vmem>>, vector<8x32xf32>
    %cst_14 = arith.constant dense<0.000000e+00> : vector<8x32xf32>
    %13 = tpu.matmul %11, %12, %cst_14 {dimension_numbers = #tpu.dot_dimension_numbers<[1], [0], [0], [1], [0, 0, 1, 1], [], []>} : vector<8x8xf32>, vector<8x32xf32>, vector<8x32xf32> -> vector<8x32xf32>
    %14 = arith.addf %10, %13 : vector<8x32xf32>
    %c0_15 = arith.constant 0 : index
    %c0_16 = arith.constant 0 : index
    %15 = vector.load %arg4[%c0_15, %c0_16] : memref<8x16xf32, #tpu.memory_space<vmem>>, vector<8x16xf32>
    %c32 = arith.constant 32 : index
    %c0_17 = arith.constant 0 : index
    %16 = vector.load %arg5[%c32, %c0_17] : memref<48x32xf32, #tpu.memory_space<vmem>>, vector<16x32xf32>
    %cst_18 = arith.constant dense<0.000000e+00> : vector<8x32xf32>
    %17 = tpu.matmul %15, %16, %cst_18 {dimension_numbers = #tpu.dot_dimension_numbers<[1], [0], [0], [1], [0, 0, 1, 1], [], []>} : vector<8x16xf32>, vector<16x32xf32>, vector<8x32xf32> -> vector<8x32xf32>
    %18 = arith.addf %14, %17 : vector<8x32xf32>
    %c0_19 = arith.constant 0 : index
    %c0_20 = arith.constant 0 : index
    %19 = vector.load %arg6[%c0_19, %c0_20] : memref<1x32xf32, #tpu.memory_space<vmem>>, vector<1x32xf32>
    %20 = vector.broadcast %19 : vector<1x32xf32> to vector<8x32xf32>
    %21 = arith.addf %18, %20 : vector<8x32xf32>
    %cst_21 = arith.constant 0.000000e+00 : f32
    %22 = vector.broadcast %cst_21 : f32 to vector<8x32xf32>
    %23 = arith.maximumf %21, %22 : vector<8x32xf32>
    %cst_22 = arith.constant dense<0.000000e+00> : vector<32xf32>
    %24 = vector.multi_reduction <add>, %23, %cst_22 [0] : vector<8x32xf32> to vector<32xf32>
    %25 = vector.shape_cast %24 : vector<32xf32> to vector<1x32xf32>
    %cst_23 = arith.constant 8.000000e+00 : f32
    %26 = vector.broadcast %cst_23 : f32 to vector<1x32xf32>
    %27 = arith.divf %25, %26 : vector<1x32xf32>
    %28 = vector.broadcast %27 : vector<1x32xf32> to vector<8x32xf32>
    %29 = arith.subf %23, %28 : vector<8x32xf32>
    %30 = arith.mulf %29, %29 : vector<8x32xf32>
    %cst_24 = arith.constant dense<0.000000e+00> : vector<32xf32>
    %31 = vector.multi_reduction <add>, %30, %cst_24 [0] : vector<8x32xf32> to vector<32xf32>
    %32 = vector.shape_cast %31 : vector<32xf32> to vector<1x32xf32>
    %cst_25 = arith.constant 8.000000e+00 : f32
    %33 = vector.broadcast %cst_25 : f32 to vector<1x32xf32>
    %34 = arith.divf %32, %33 : vector<1x32xf32>
    %cst_26 = arith.constant 9.99999974E-6 : f32
    %35 = vector.broadcast %cst_26 : f32 to vector<1x32xf32>
    %36 = arith.addf %34, %35 : vector<1x32xf32>
    %37 = math.rsqrt %36 : vector<1x32xf32>
    %38 = vector.broadcast %37 : vector<1x32xf32> to vector<8x32xf32>
    %39 = arith.mulf %29, %38 : vector<8x32xf32>
    %c0_27 = arith.constant 0 : index
    %c0_28 = arith.constant 0 : index
    %40 = vector.load %arg7[%c0_27, %c0_28] : memref<32x16xf32, #tpu.memory_space<vmem>>, vector<32x16xf32>
    %cst_29 = arith.constant dense<0.000000e+00> : vector<8x16xf32>
    %41 = tpu.matmul %39, %40, %cst_29 {dimension_numbers = #tpu.dot_dimension_numbers<[1], [0], [0], [1], [0, 0, 1, 1], [], []>} : vector<8x32xf32>, vector<32x16xf32>, vector<8x16xf32> -> vector<8x16xf32>
    %c0_30 = arith.constant 0 : index
    %c0_31 = arith.constant 0 : index
    %42 = vector.load %arg8[%c0_30, %c0_31] : memref<1x16xf32, #tpu.memory_space<vmem>>, vector<1x16xf32>
    %43 = vector.broadcast %42 : vector<1x16xf32> to vector<8x16xf32>
    %44 = arith.addf %41, %43 : vector<8x16xf32>
    %cst_32 = arith.constant 0.000000e+00 : f32
    %45 = vector.broadcast %cst_32 : f32 to vector<8x16xf32>
    %46 = arith.maximumf %44, %45 : vector<8x16xf32>
    %cst_33 = arith.constant dense<0.000000e+00> : vector<16xf32>
    %47 = vector.multi_reduction <add>, %46, %cst_33 [0] : vector<8x16xf32> to vector<16xf32>
    %48 = vector.shape_cast %47 : vector<16xf32> to vector<1x16xf32>
    %cst_34 = arith.constant 8.000000e+00 : f32
    %49 = vector.broadcast %cst_34 : f32 to vector<1x16xf32>
    %50 = arith.divf %48, %49 : vector<1x16xf32>
    %51 = vector.broadcast %50 : vector<1x16xf32> to vector<8x16xf32>
    %52 = arith.subf %46, %51 : vector<8x16xf32>
    %53 = arith.mulf %52, %52 : vector<8x16xf32>
    %cst_35 = arith.constant dense<0.000000e+00> : vector<16xf32>
    %54 = vector.multi_reduction <add>, %53, %cst_35 [0] : vector<8x16xf32> to vector<16xf32>
    %55 = vector.shape_cast %54 : vector<16xf32> to vector<1x16xf32>
    %cst_36 = arith.constant 8.000000e+00 : f32
    %56 = vector.broadcast %cst_36 : f32 to vector<1x16xf32>
    %57 = arith.divf %55, %56 : vector<1x16xf32>
    %cst_37 = arith.constant 9.99999974E-6 : f32
    %58 = vector.broadcast %cst_37 : f32 to vector<1x16xf32>
    %59 = arith.addf %57, %58 : vector<1x16xf32>
    %60 = math.rsqrt %59 : vector<1x16xf32>
    %61 = vector.broadcast %60 : vector<1x16xf32> to vector<8x16xf32>
    %62 = arith.mulf %52, %61 : vector<8x16xf32>
    %c0_38 = arith.constant 0 : index
    %c0_39 = arith.constant 0 : index
    %63 = vector.load %arg9[%c0_38, %c0_39] : memref<1x16xf32, #tpu.memory_space<vmem>>, vector<1x16xf32>
    %64 = vector.broadcast %63 : vector<1x16xf32> to vector<8x16xf32>
    %65 = arith.mulf %62, %64 : vector<8x16xf32>
    %cst_40 = arith.constant dense<0.000000e+00> : vector<8xf32>
    %66 = vector.multi_reduction <add>, %65, %cst_40 [1] : vector<8x16xf32> to vector<8xf32>
    %67 = vector.shape_cast %66 : vector<8xf32> to vector<8x1xf32>
    %c0_41 = arith.constant 0 : index
    %c0_42 = arith.constant 0 : index
    %68 = vector.load %arg10[%c0_41, %c0_42] : memref<1x1xf32, #tpu.memory_space<vmem>>, vector<1x1xf32>
    %69 = vector.broadcast %68 : vector<1x1xf32> to vector<8x1xf32>
    %70 = arith.addf %67, %69 : vector<8x1xf32>
    %c0_43 = arith.constant 0 : index
    %c0_44 = arith.constant 0 : index
    %71 = vector.load %arg11[%c0_43, %c0_44] : memref<8x1xf32, #tpu.memory_space<vmem>>, vector<8x1xf32>
    tpu.vector_store %arg11[%c0_43, %c0_44], %70 {strides = array<i32>} : memref<8x1xf32, #tpu.memory_space<vmem>>, vector<8x1xf32>,
    return
  }
}

</mosaic_0001>

<bundles_post_ra>
// kernel: tpu_custom_call.1
= control target key start
LH: loop header
LB: loop body
LE: loop exit
PB: predicated region body
PF: predicated region fallthrough
CT: control target
= control target key end

     0   :  { %vm44_vm0 = vcmask 64512   ;;  %vm146_vm1 = vcmask 130048   ;;  %v313_v17 = vmov 8.0   ;;  %vm177_vm2 = vcmask 261120   ;;  %s445_s5 = inlined_call_operand.vmem [shape: f32[48,32], index: 5, kind: input, shape index: {}]   ;;  %s446_s2 = inlined_call_operand.vmem [shape: f32[8,8], index: 2, kind: input, shape index: {}]   ;;  %s447_s1 = inlined_call_operand.vmem [shape: f32[8,8], index: 1, kind: input, shape index: {}]   ;;  %s448_s0 = inlined_call_operand.vmem [shape: f32[8,8], index: 0, kind: input, shape index: {}]   ;;  %s449_s3 = inlined_call_operand.vmem [shape: f32[8,8], index: 3, kind: input, shape index: {}]   ;;  %s450_s4 = inlined_call_operand.vmem [shape: f32[8,16], index: 4, kind: input, shape index: {}]   ;;  %s451_s6 = inlined_call_operand.vmem [shape: f32[1,32], index: 6, kind: input, shape index: {}]   ;;  %s452_s8 = inlined_call_operand.vmem [shape: f32[1,16], index: 8, kind: input, shape index: {}]   ;;  %s453_s7 = inlined_call_operand.vmem [shape: f32[32,16], index: 7, kind: input, shape index: {}]   ;;  %s454_s9 = inlined_call_operand.vmem [shape: f32[1,16], index: 9, kind: input, shape index: {}]   ;;  %s455_s10 = inlined_call_operand.<no memory space> [shape: f32[1,1], index: 10, kind: input, shape index: {}]   ;;  %s456_s11 = inlined_call_operand.vmem [shape: f32[8,1], index: 11, kind: output, shape index: {}]  }
   0x1   :  { %v92_v0 = vld [vmem:[%s445_s5 + $0x10] sm:$0xff]  ;;  %v91_v1 = vld [vmem:[%s446_s2] sm:$0xff]  ;;  %v43_v2 = vld [vmem:[%s445_s5 + $0x8] sm:$0xff]  ;;  %307 = vrcp.f32 %v313_v17  ;;  %vm290_vm10 = vcmask 7168  }
   0x2   :  { %111 = vmatpush.msra.mxu2 %v92_v0  ;;  %63 = vmatpush.msra.mxu0 %v43_v2  ;;  %v41_v3 = vld [vmem:[%s445_s5] sm:$0xff]  ;;  %v118_v4 = vld [vmem:[%s445_s5 + $0x18] sm:$0xff]  ;;  %v145_v8 = vld [vmem:[%s445_s5 + $0x28] sm:$0xff] }
   0x3   :  { %v42_v5 = vld [vmem:[%s447_s1] sm:$0xff]  ;;  %298 = vmatmul.msk.f32.vlgmr.msra.gmra.mxu2 %vm44_vm0, %v91_v1  ;;  %86 = vmatpush.msra.mxu1 %v41_v3  ;;  %v218_v11 = vld [vmem:[%s453_s7 + $0x18] sm:$0xff]  ;;  %v217_v12 = vld [vmem:[%s453_s7 + $0x10] sm:$0xff] }
   0x4   :  { %v40_v6 = vld [vmem:[%s448_s0] sm:$0xff]  ;;  %137 = vmatpush.msra.mxu3 %v118_v4  ;;  %296 = vmatmul.msk.f32.vlgmr.msra.gmra.mxu0 %vm44_vm0, %v42_v5  ;;  %v216_v13 = vld [vmem:[%s453_s7 + $0x8] sm:$0xff] }
   0x5   :  { %v117_v7 = vld [vmem:[%s449_s3] sm:$0xff]  ;;  %297 = vmatmul.msk.f32.vlgmr.msra.gmra.mxu1 %vm44_vm0, %v40_v6  ;;  %164 = vmatpush.msrb.mxu0 %v145_v8 }
   0x6   :  { %299 = vmatmul.msk.f32.vlgmr.msra.gmra.mxu3 %vm44_vm0, %v117_v7  ;;  %v144_v9 = vld [vmem:[%s445_s5 + $0x20] sm:$0xff]  ;;  %238 = vmatpush.msrb.mxu1 %v218_v11 }
   0x7   :  { %165 = vmatpush.msrb.mxu0 %v144_v9  ;;  %v143_v10 = vld [vmem:[%s450_s4] sm:$0xff]  ;;  %v308_v21 = vpop.eup %307 }
   0x8   :  { %239 = vmatpush.msrb.mxu1 %v217_v12  ;;  %v215_v14 = vld [vmem:[%s453_s7] sm:$0xff]  ;;  %v186_v27 = vmul.f32 8.0, %v308_v21  ;;  %vm190_vm3 = vweird.f32 %v308_v21 }
   0x9   :  { %v303_v25 = vld [vmem:[%s451_s6] ss:$0 sm:$0xff] }
   0xa   :  { %240 = vmatpush.msrb.mxu1 %v216_v13  ;;  %v187_v30 = vsub.f32 1.0, %v186_v27  ;;  %v304_v61 = vld [vmem:[%s452_s8] ss:$0 sm:$0xff] }
   0xb   :  { %v305_v27 = vld [vmem:[%s454_s9] ss:$0 sm:$0xff] }
   0xc   :  { %300 = vmatmul.msk.f32.vlgmr.msrb.gmra.mxu0 %vm146_vm1, %v143_v10  ;;  %241 = vmatpush.msrb.mxu1 %v215_v14  ;;  %v188_v33 = vmul.f32 %v308_v21, %v187_v30 }
   0xe   :  { %v189_v36 = vadd.f32 %v308_v21, %v188_v33 }
  0x10   :  { %v191_v39 = vsel %vm190_vm3, %v308_v21, %v189_v36 }
  0x81   :  { %v65_v15 = vpop.f32.mrf.mxu0 }
  0x82   :  { %v88_v16 = vpop.f32.mrf.mxu1 }
  0x83   :  { %v89_v18 = vadd.f32 %v88_v16, %v65_v15  ;;  %v16_v16 = vstv %s455_s10 }
  0x84   :  { %17 = vst [vmem:[#allocation2] sm:$0x1] %v16_v16 }
  0x86   :  { %v113_v19 = vpop.f32.mrf.mxu2 }
  0x87   :  { %v116_v20 = vadd.f32 %v113_v19, %v89_v18 }
  0x89   :  { %v139_v22 = vpop.f32.mrf.mxu3  ;;  %v167_v24 = vpop.f32.mrf.mxu0 }
  0x8a   :  { %v142_v23 = vadd.f32 %v139_v22, %v116_v20 }
  0x8c   :  { %v170_v26 = vadd.f32 %v167_v24, %v142_v23 }
  0x8e   :  { %v175_v28 = vadd.f32 %v303_v25, %v170_v26 }
  0x90   :  { %v176_v29 = vmax.f32 %v175_v28, 0.0 }
  0x92   :  { %v178_v31 = vsel %vm177_vm2, %v176_v29, 0.0 }
  0x93   :  { %v179_v32 = vrot.slane %v178_v31, 4 }
  0x95   :  { %v180_v34 = vadd.f32 %v179_v32, %v178_v31  ;;  %v306_v32 = vld [vmem:[#allocation2] ss:$0 sm:$0xff] }
  0x97   :  { %v181_v35 = vrot.slane %v180_v34, 2 }
  0x99   :  { %v182_v37 = vadd.f32 %v181_v35, %v180_v34 }
  0x9b   :  { %v183_v38 = vrot.slane %v182_v37, 1 }
  0x9d   :  { %v184_v40 = vadd.f32 %v183_v38, %v182_v37 }
  0x9f   :  { %v192_v41 = vmul.f32 %v191_v39, %v184_v40 }
  0xa1   :  { %v193_v42 = vsub.f32 %v176_v29, %v192_v41 }
  0xa3   :  { %v194_v43 = vmul.f32 %v193_v42, %v193_v42 }
  0xa5   :  { %v195_v44 = vsel %vm177_vm2, %v194_v43, 0.0 }
  0xa6   :  { %v196_v45 = vrot.slane %v195_v44, 4 }
  0xa8   :  { %v197_v46 = vadd.f32 %v196_v45, %v195_v44 }
  0xaa   :  { %v198_v47 = vrot.slane %v197_v46, 2 }
  0xac   :  { %v199_v48 = vadd.f32 %v198_v47, %v197_v46 }
  0xae   :  { %v200_v49 = vrot.slane %v199_v48, 1 }
  0xb0   :  { %v201_v50 = vadd.f32 %v200_v49, %v199_v48 }
  0xb2   :  { %v202_v51 = vmul.f32 %v201_v50, %v191_v39 }
  0xb4   :  { %v203_v52 = vadd.f32 1e-05, %v202_v51 }
  0xb6   :  { %309 = vrsqrt.f32 %v203_v52  ;;  %vm210_vm5 = vweird.f32 %v203_v52 }
  0xbc   :  { %v310_v53 = vpop.eup %309 }
  0xbd   :  { %v205_v54 = vmul.f32 %v310_v53, %v203_v52  ;;  %vm211_vm4 = vweird.f32 %v310_v53 }
  0xbe   :  { %vm212_vm6 = vmor %vm210_vm5, %vm211_vm4 }
  0xbf   :  { %v206_v55 = vmul.f32 %v310_v53, %v205_v54 }
  0xc1   :  { %v207_v56 = vmul.f32 0.5, %v206_v55 }
  0xc3   :  { %v208_v57 = vsub.f32 1.5, %v207_v56 }
  0xc5   :  { %v209_v58 = vmul.f32 %v310_v53, %v208_v57 }
  0xc7   :  { %v213_v59 = vsel %vm212_vm6, %v310_v53, %v209_v58 }
  0xc8   :  { %v214_v60 = vmul.f32 %v213_v59, %v193_v42 }
  0xca   :  { %301 = vmatmul.msk.f32.vlgmr.msrb.gmra.mxu1 %vm177_vm2, %v214_v60 }
 0x147   :  { %v243_v62 = vpop.f32.mrf.mxu1 }
 0x148   :  { %v244_v63 = vadd.f32 %v304_v61, %v243_v62 }
 0x14a   :  { %v246_v0 = vmax.f32 %v244_v63, 0.0 }
 0x14c   :  { %v247_v1 = vsel %vm146_vm1, %v246_v0, 0.0 }
 0x14d   :  { %v248_v2 = vrot.slane %v247_v1, 4 }
 0x14f   :  { %v249_v3 = vadd.f32 %v248_v2, %v247_v1 }
 0x151   :  { %v250_v4 = vrot.slane %v249_v3, 2 }
 0x153   :  { %v251_v5 = vadd.f32 %v250_v4, %v249_v3 }
 0x155   :  { %v252_v6 = vrot.slane %v251_v5, 1 }
 0x157   :  { %v253_v7 = vadd.f32 %v252_v6, %v251_v5 }
 0x159   :  { %v254_v8 = vmul.f32 %v253_v7, %v191_v39 }
 0x15b   :  { %v255_v9 = vsub.f32 %v246_v0, %v254_v8 }
 0x15d   :  { %v256_v10 = vmul.f32 %v255_v9, %v255_v9 }
 0x15f   :  { %v257_v11 = vsel %vm146_vm1, %v256_v10, 0.0 }
 0x160   :  { %v258_v12 = vrot.slane %v257_v11, 4 }
 0x162   :  { %v259_v13 = vadd.f32 %v258_v12, %v257_v11 }
 0x164   :  { %v260_v14 = vrot.slane %v259_v13, 2 }
 0x166   :  { %v261_v15 = vadd.f32 %v260_v14, %v259_v13 }
 0x168   :  { %v262_v17 = vrot.slane %v261_v15, 1 }
 0x16a   :  { %v263_v18 = vadd.f32 %v262_v17, %v261_v15 }
 0x16c   :  { %v264_v19 = vmul.f32 %v263_v18, %v191_v39 }
 0x16e   :  { %v265_v20 = vadd.f32 1e-05, %v264_v19 }
 0x170   :  { %311 = vrsqrt.f32 %v265_v20  ;;  %vm272_vm8 = vweird.f32 %v265_v20 }
 0x176   :  { %v312_v21 = vpop.eup %311 }
 0x177   :  { %v267_v22 = vmul.f32 %v312_v21, %v265_v20  ;;  %vm273_vm7 = vweird.f32 %v312_v21 }
 0x178   :  { %vm274_vm9 = vmor %vm272_vm8, %vm273_vm7 }
 0x179   :  { %v268_v23 = vmul.f32 %v312_v21, %v267_v22 }
 0x17b   :  { %v269_v24 = vmul.f32 0.5, %v268_v23 }
 0x17d   :  { %v270_v25 = vsub.f32 1.5, %v269_v24 }
 0x17f   :  { %v271_v26 = vmul.f32 %v312_v21, %v270_v25 }
 0x181   :  { %v275_v28 = vsel %vm274_vm9, %v312_v21, %v271_v26 }
 0x182   :  { %v276_v29 = vmul.f32 %v275_v28, %v255_v9 }
 0x184   :  { %v281_v30 = vmul.f32 %v305_v27, %v276_v29 }
 0x186   :  { %v282_v31 = vsel %vm146_vm1, %v281_v30, 0.0 }
 0x187   :  { %283 = vadd.xlane.f32.xlu0 %v282_v31 }
 0x1fa   :  { %v284_v33 = vpop.xlane.xlu0 %283 }
 0x1fb   :  { %v289_v34 = vadd.f32 %v306_v32, %v284_v33 }
 0x1fd   :  { %291 = vst.msk [vmem:[%s456_s11] sm:$0xff] %vm290_vm10, %v289_v34 }

</bundles_post_ra>
